<compile_context>
chip_gen: v7x
topology: tpu7x:2x2x1
jax: 0.10.0
libtpu: 0.0.40
codegen_flags: <defaults>
</compile_context>

<pallas_src>
import functools

import jax
import jax.numpy as jnp
from jax.experimental import pallas as pl
from jax.experimental.pallas import tpu as pltpu


def _round_up(x, m):
    return (x + m - 1) // m * m


# ----------------------------- kernels ------------------------------------- #

def _stage1_kernel(x1_ref, x2_ref, w1a_ref, w1b_ref, b1_ref, h_ref, stats_ref,
                   *, batch, tile_b, needs_mask):
    # Linear1 (concat folded into two K-slices) + ReLU, f32 accumulation.
    h = jnp.dot(x1_ref[...], w1a_ref[...], preferred_element_type=jnp.float32)
    h = h + jnp.dot(x2_ref[...], w1b_ref[...],
                    preferred_element_type=jnp.float32)
    h = jnp.maximum(h + b1_ref[...], 0.0)
    h_ref[...] = h

    # Per-tile partial batch statistics (mask out padded rows so global
    # mean/var match torch BatchNorm1d training-mode statistics).
    if needs_mask:
        rows = pl.program_id(0) * tile_b + jax.lax.broadcasted_iota(
            jnp.int32, (tile_b, 1), 0)
        hm = h * (rows < batch).astype(jnp.float32)
    else:
        hm = h
    ssum = jnp.sum(hm, axis=0, keepdims=True)        # (1, H)  sum(h)
    ssq = jnp.sum(hm * h, axis=0, keepdims=True)     # (1, H)  sum(h*h) masked
    stats_ref[0] = jnp.concatenate([ssum, ssq], axis=0)


def _stage2_kernel(h_ref, w2_ref, b2_ref, o_ref):
    # BN affine is already folded into w2'/b2' by the wrapper.
    h = h_ref[...].astype(jnp.bfloat16)
    logits = jnp.dot(h, w2_ref[...], preferred_element_type=jnp.float32)
    logits = logits + b2_ref[...]                    # padded cols get -1e30
    m = jnp.max(logits, axis=-1, keepdims=True)
    e = jnp.exp(logits - m)
    inv = pl.reciprocal(jnp.sum(e, axis=-1, keepdims=True), approx=False)
    o_ref[...] = e * inv


# ----------------------------- wrapper -------------------------------------- #

def concat_mlp_forward(x1, x2, params, *, tile_b=512,
                       vmem_limit_bytes=48 * 1024 * 1024):
    """Forward pass equivalent to concatMLP (BatchNorm in training mode)."""
    w1, b1, gamma, beta, w2, b2 = params
    B, d1 = x1.shape
    d2 = x2.shape[1]
    H = w1.shape[1]
    C = w2.shape[1]

    # Batch tiling: second-to-last block dim must be a multiple of 8.
    TB = min(int(tile_b), _round_up(B, 8))
    B_pad = _round_up(B, TB)
    G = B_pad // TB
    needs_mask = B_pad != B

    def pad_rows(x):
        return jnp.pad(x, ((0, B_pad - B), (0, 0))) if needs_mask else x

    # bf16 MXU operands; accumulation stays f32 inside the kernels.
    x1p = pad_rows(x1).astype(jnp.bfloat16)
    x2p = pad_rows(x2).astype(jnp.bfloat16)
    w1a = w1[:d1].astype(jnp.bfloat16)     # split of w1 == in-kernel concat
    w1b = w1[d1:].astype(jnp.bfloat16)

    cparams = pltpu.CompilerParams(
        dimension_semantics=("parallel",),          # both TCs on v7x
        vmem_limit_bytes=vmem_limit_bytes,          # < 64 MiB (v7x-safe)
    )

    # ---- stage 1: Linear1 + ReLU + per-tile masked sum / sumsq partials ----
    stage1 = functools.partial(_stage1_kernel, batch=B, tile_b=TB,
                               needs_mask=needs_mask)
    h, stats = pl.pallas_call(
        stage1,
        out_shape=(jax.ShapeDtypeStruct((B_pad, H), jnp.float32),
                   jax.ShapeDtypeStruct((G, 2, H), jnp.float32)),
        grid=(G,),
        in_specs=[
            pl.BlockSpec((TB, d1), lambda i: (i, 0)),       # x1 tile (streams)
            pl.BlockSpec((TB, d2), lambda i: (i, 0)),       # x2 tile (streams)
            pl.BlockSpec((d1, H), lambda i: (0, 0)),        # w1a (resident)
            pl.BlockSpec((d2, H), lambda i: (0, 0)),        # w1b (resident)
            pl.BlockSpec((1, H), lambda i: (0, 0)),         # b1  (resident)
        ],
        out_specs=(
            pl.BlockSpec((TB, H), lambda i: (i, 0)),        # h tile
            pl.BlockSpec((1, 2, H), lambda i: (i, 0, 0)),   # per-tile partials
        ),
        compiler_params=cparams,
    )(x1p, x2p, w1a, w1b, b1)

    # ---- tiny glue: global batch stats; fold BN affine into Linear2 ----
    sums = jnp.sum(stats, axis=0)                        # (2, H)
    mean = sums[0] / B
    var = jnp.maximum(sums[1] / B - mean * mean, 0.0)    # biased (training)
    scale = gamma[0] * jax.lax.rsqrt(var + 1e-5)         # (H,)
    shift = beta[0] - mean * scale                       # (H,)
    w2f = w2 * scale[:, None]                            # (H, C)
    b2f = b2[0] + shift @ w2                             # (C,)

    # Lane-dense output: pad classes to a multiple of 128; padded logits get a
    # huge negative bias so exp(.) == 0 and they never affect the softmax.
    C_pad = _round_up(C, 128)
    w2p = jnp.zeros((H, C_pad), jnp.float32).at[:, :C].set(w2f)
    w2p = w2p.astype(jnp.bfloat16)
    b2p = jnp.full((1, C_pad), -1e30, jnp.float32).at[0, :C].set(b2f)

    # ---- stage 2: (BN-fused) Linear2 + softmax ----
    out = pl.pallas_call(
        _stage2_kernel,
        out_shape=jax.ShapeDtypeStruct((B_pad, C_pad), jnp.float32),
        grid=(G,),
        in_specs=[
            pl.BlockSpec((TB, H), lambda i: (i, 0)),        # h tile (streams)
            pl.BlockSpec((H, C_pad), lambda i: (0, 0)),     # w2' (resident)
            pl.BlockSpec((1, C_pad), lambda i: (0, 0)),     # b2' (resident)
        ],
        out_specs=pl.BlockSpec((TB, C_pad), lambda i: (i, 0)),
        compiler_params=cparams,
    )(h, w2p, b2p)

    return out[:B, :C]


# -------------------------- params & reference ------------------------------ #

def init_params(key, input_dim1, input_dim2, num_classes, hidden=256):
    """Deterministic params matching torch's kaiming_normal_ init.

    kaiming_normal_ on Linear.weight (out, in): std = sqrt(2 / fan_in); bias 0.
    BatchNorm1d: gamma = 1, beta = 0.  Weights stored as (in, out) for x @ W.
    """
    input_dim = input_dim1 + input_dim2
    k1, k2 = jax.random.split(key, 2)

    std1 = (2.0 / input_dim) ** 0.5
    w1 = std1 * jax.random.normal(k1, (input_dim, hidden), dtype=jnp.float32)
    b1 = jnp.zeros((1, hidden), dtype=jnp.float32)

    gamma = jnp.ones((1, hidden), dtype=jnp.float32)
    beta = jnp.zeros((1, hidden), dtype=jnp.float32)

    std2 = (2.0 / hidden) ** 0.5
    w2 = std2 * jax.random.normal(k2, (hidden, num_classes), dtype=jnp.float32)
    b2 = jnp.zeros((1, num_classes), dtype=jnp.float32)

    return (w1, b1, gamma, beta, w2, b2)


def reference_forward(x1, x2, params):
    """Pure-JAX f32 reference for correctness checking."""
    w1, b1, gamma, beta, w2, b2 = params
    x = jnp.concatenate([x1, x2], axis=1).astype(jnp.float32)
    h = jnp.maximum(x @ w1 + b1, 0.0)
    mean = jnp.mean(h, axis=0, keepdims=True)
    var = jnp.mean((h - mean) ** 2, axis=0, keepdims=True)
    h = (h - mean) / jnp.sqrt(var + 1e-5) * gamma + beta
    logits = h @ w2 + b2
    return jax.nn.softmax(logits, axis=-1)


# ---------------------------------- main ------------------------------------ #

if __name__ == "__main__":
    # Small shapes consistent with the module's forward.  B=10 deliberately
    # exercises the batch-padding + masked-statistics path.
    B, D1, D2, C = 10, 16, 16, 10
    key = jax.random.PRNGKey(0)
    kx1, kx2, kp = jax.random.split(key, 3)

    x1 = jax.random.normal(kx1, (B, D1), dtype=jnp.float32)
    x2 = jax.random.normal(kx2, (B, D2), dtype=jnp.float32)
    params = init_params(kp, D1, D2, C)

    fwd = jax.jit(concat_mlp_forward)
    out = jax.block_until_ready(fwd(x1, x2, params))

    ref = reference_forward(x1, x2, params)
    assert out.shape == (B, C)
    # Softmax rows sum to 1 exactly (normalization is exact f32).
    assert jnp.allclose(jnp.sum(out, axis=-1), 1.0, atol=1e-5)
    # Kernel uses bf16 MXU operands (f32 accumulation); compare against the
    # all-f32 reference with a tolerance that covers bf16 input rounding.
    err = float(jnp.max(jnp.abs(out - ref)))
    assert err < 1e-2, f"mismatch vs f32 reference: max abs err = {err}"

    print("KERNEL_OK")
</pallas_src>

<mosaic_0001>
module attributes {stable_mosaic.version = 11 : i64} {
  func.func @_stage1_kernel(%arg0: i32, %arg1: memref<16x16xbf16, #tpu.memory_space<vmem>>, %arg2: memref<16x16xbf16, #tpu.memory_space<vmem>>, %arg3: memref<16x256xbf16, #tpu.memory_space<vmem>>, %arg4: memref<16x256xbf16, #tpu.memory_space<vmem>>, %arg5: memref<1x256xf32, #tpu.memory_space<vmem>>, %arg6: memref<16x256xf32, #tpu.memory_space<vmem>>, %arg7: memref<1x2x256xf32, #tpu.memory_space<vmem>>) attributes {dimension_semantics = [#tpu.dimension_semantics<parallel>], iteration_bounds = array<i64: 1>, scalar_prefetch = 0 : i64, scratch_operands = 0 : i64, tpu.core_type = #tpu.core_type<tc>, window_params = [{transform_indices = @transform_0, window_bounds = array<i64: 16, 16>}, {transform_indices = @transform_1, window_bounds = array<i64: 16, 16>}, {pipeline_mode = #tpu.pipeline_mode<synchronous>, transform_indices = @transform_2, window_bounds = array<i64: 16, 256>}, {pipeline_mode = #tpu.pipeline_mode<synchronous>, transform_indices = @transform_3, window_bounds = array<i64: 16, 256>}, {pipeline_mode = #tpu.pipeline_mode<synchronous>, transform_indices = @transform_4, window_bounds = array<i64: 1, 256>}, {transform_indices = @transform_5, window_bounds = array<i64: 16, 256>}, {transform_indices = @transform_6, window_bounds = array<i64: 1, 2, 256>}]} {
    %c0 = arith.constant 0 : index
    %c0_0 = arith.constant 0 : index
    %0 = vector.load %arg1[%c0, %c0_0] : memref<16x16xbf16, #tpu.memory_space<vmem>>, vector<16x16xbf16>
    %c0_1 = arith.constant 0 : index
    %c0_2 = arith.constant 0 : index
    %1 = vector.load %arg3[%c0_1, %c0_2] : memref<16x256xbf16, #tpu.memory_space<vmem>>, vector<16x256xbf16>
    %cst = arith.constant dense<0.000000e+00> : vector<16x256xf32>
    %2 = tpu.matmul %0, %1, %cst {dimension_numbers = #tpu.dot_dimension_numbers<[1], [0], [0], [1], [0, 0, 1, 1], [], []>} : vector<16x16xbf16>, vector<16x256xbf16>, vector<16x256xf32> -> vector<16x256xf32>
    %c0_3 = arith.constant 0 : index
    %c0_4 = arith.constant 0 : index
    %3 = vector.load %arg2[%c0_3, %c0_4] : memref<16x16xbf16, #tpu.memory_space<vmem>>, vector<16x16xbf16>
    %c0_5 = arith.constant 0 : index
    %c0_6 = arith.constant 0 : index
    %4 = vector.load %arg4[%c0_5, %c0_6] : memref<16x256xbf16, #tpu.memory_space<vmem>>, vector<16x256xbf16>
    %cst_7 = arith.constant dense<0.000000e+00> : vector<16x256xf32>
    %5 = tpu.matmul %3, %4, %cst_7 {dimension_numbers = #tpu.dot_dimension_numbers<[1], [0], [0], [1], [0, 0, 1, 1], [], []>} : vector<16x16xbf16>, vector<16x256xbf16>, vector<16x256xf32> -> vector<16x256xf32>
    %6 = arith.addf %2, %5 : vector<16x256xf32>
    %c0_8 = arith.constant 0 : index
    %c0_9 = arith.constant 0 : index
    %7 = vector.load %arg5[%c0_8, %c0_9] : memref<1x256xf32, #tpu.memory_space<vmem>>, vector<1x256xf32>
    %8 = vector.broadcast %7 : vector<1x256xf32> to vector<16x256xf32>
    %9 = arith.addf %6, %8 : vector<16x256xf32>
    %cst_10 = arith.constant 0.000000e+00 : f32
    %10 = vector.broadcast %cst_10 : f32 to vector<16x256xf32>
    %11 = arith.maximumf %9, %10 : vector<16x256xf32>
    %c0_11 = arith.constant 0 : index
    %c0_12 = arith.constant 0 : index
    %12 = vector.load %arg6[%c0_11, %c0_12] : memref<16x256xf32, #tpu.memory_space<vmem>>, vector<16x256xf32>
    tpu.vector_store %arg6[%c0_11, %c0_12], %11 {strides = array<i32>} : memref<16x256xf32, #tpu.memory_space<vmem>>, vector<16x256xf32>,
    %c16_i32 = arith.constant 16 : i32
    %13 = arith.muli %arg0, %c16_i32 : i32
    %14 = tpu.iota {dimensions = array<i32: 0>} : vector<16x1xi32>
    %15 = vector.broadcast %13 : i32 to vector<16x1xi32>
    %16 = arith.addi %15, %14 : vector<16x1xi32>
    %c10_i32 = arith.constant 10 : i32
    %17 = vector.broadcast %c10_i32 : i32 to vector<16x1xi32>
    %18 = arith.cmpi slt, %16, %17 : vector<16x1xi32>
    %19 = arith.extui %18 : vector<16x1xi1> to vector<16x1xi32>
    %20 = arith.sitofp %19 : vector<16x1xi32> to vector<16x1xf32>
    %21 = vector.broadcast %20 : vector<16x1xf32> to vector<16x256xf32>
    %22 = arith.mulf %11, %21 : vector<16x256xf32>
    %cst_13 = arith.constant dense<0.000000e+00> : vector<256xf32>
    %23 = vector.multi_reduction <add>, %22, %cst_13 [0] : vector<16x256xf32> to vector<256xf32>
    %24 = vector.shape_cast %23 : vector<256xf32> to vector<1x256xf32>
    %25 = arith.mulf %22, %11 : vector<16x256xf32>
    %cst_14 = arith.constant dense<0.000000e+00> : vector<256xf32>
    %26 = vector.multi_reduction <add>, %25, %cst_14 [0] : vector<16x256xf32> to vector<256xf32>
    %27 = vector.shape_cast %26 : vector<256xf32> to vector<1x256xf32>
    %28 = tpu.concatenate %24, %27 in 0 : vector<1x256xf32>, vector<1x256xf32> -> vector<2x256xf32>
    %c0_15 = arith.constant 0 : index
    %c0_16 = arith.constant 0 : index
    %c0_17 = arith.constant 0 : index
    %29 = vector.load %arg7[%c0_15, %c0_16, %c0_17] : memref<1x2x256xf32, #tpu.memory_space<vmem>>, vector<1x2x256xf32>
    %30 = vector.shape_cast %29 : vector<1x2x256xf32> to vector<2x256xf32>
    %31 = vector.shape_cast %28 : vector<2x256xf32> to vector<1x2x256xf32>
    tpu.vector_store %arg7[%c0_15, %c0_16, %c0_17], %31 {strides = array<i32>} : memref<1x2x256xf32, #tpu.memory_space<vmem>>, vector<1x2x256xf32>,
    return
  }
  func.func @transform_0(%arg0: i32) -> (i32, i32) {
    %c0_i32 = arith.constant 0 : i32
    %c0_i32_0 = arith.constant 0 : i32
    return %arg0, %c0_i32 : i32, i32
  }
  func.func @transform_1(%arg0: i32) -> (i32, i32) {
    %c0_i32 = arith.constant 0 : i32
    %c0_i32_0 = arith.constant 0 : i32
    return %arg0, %c0_i32 : i32, i32
  }
  func.func @transform_2(%arg0: i32) -> (i32, i32) {
    %c0_i32 = arith.constant 0 : i32
    %c0_i32_0 = arith.constant 0 : i32
    %c0_i32_1 = arith.constant 0 : i32
    return %c0_i32, %c0_i32_0 : i32, i32
  }
  func.func @transform_3(%arg0: i32) -> (i32, i32) {
    %c0_i32 = arith.constant 0 : i32
    %c0_i32_0 = arith.constant 0 : i32
    %c0_i32_1 = arith.constant 0 : i32
    return %c0_i32, %c0_i32_0 : i32, i32
  }
  func.func @transform_4(%arg0: i32) -> (i32, i32) {
    %c0_i32 = arith.constant 0 : i32
    %c0_i32_0 = arith.constant 0 : i32
    %c0_i32_1 = arith.constant 0 : i32
    return %c0_i32, %c0_i32_0 : i32, i32
  }
  func.func @transform_5(%arg0: i32) -> (i32, i32) {
    %c0_i32 = arith.constant 0 : i32
    %c0_i32_0 = arith.constant 0 : i32
    return %arg0, %c0_i32 : i32, i32
  }
  func.func @transform_6(%arg0: i32) -> (i32, i32, i32) {
    %c0_i32 = arith.constant 0 : i32
    %c0_i32_0 = arith.constant 0 : i32
    %c0_i32_1 = arith.constant 0 : i32
    return %arg0, %c0_i32, %c0_i32_0 : i32, i32, i32
  }
}

module attributes {stable_mosaic.version = 11 : i64} {
  func.func @_stage2_kernel(%arg0: i32, %arg1: memref<16x256xf32, #tpu.memory_space<vmem>>, %arg2: memref<256x128xbf16, #tpu.memory_space<vmem>>, %arg3: memref<1x128xf32, #tpu.memory_space<vmem>>, %arg4: memref<16x128xf32, #tpu.memory_space<vmem>>) attributes {dimension_semantics = [#tpu.dimension_semantics<parallel>], iteration_bounds = array<i64: 1>, scalar_prefetch = 0 : i64, scratch_operands = 0 : i64, tpu.core_type = #tpu.core_type<tc>, window_params = [{transform_indices = @transform_0, window_bounds = array<i64: 16, 256>}, {pipeline_mode = #tpu.pipeline_mode<synchronous>, transform_indices = @transform_1, window_bounds = array<i64: 256, 128>}, {pipeline_mode = #tpu.pipeline_mode<synchronous>, transform_indices = @transform_2, window_bounds = array<i64: 1, 128>}, {transform_indices = @transform_3, window_bounds = array<i64: 16, 128>}]} {
    %c0 = arith.constant 0 : index
    %c0_0 = arith.constant 0 : index
    %0 = vector.load %arg1[%c0, %c0_0] : memref<16x256xf32, #tpu.memory_space<vmem>>, vector<16x256xf32>
    %1 = arith.truncf %0 : vector<16x256xf32> to vector<16x256xbf16>
    %c0_1 = arith.constant 0 : index
    %c0_2 = arith.constant 0 : index
    %2 = vector.load %arg2[%c0_1, %c0_2] : memref<256x128xbf16, #tpu.memory_space<vmem>>, vector<256x128xbf16>
    %cst = arith.constant dense<0.000000e+00> : vector<16x128xf32>
    %3 = tpu.matmul %1, %2, %cst {dimension_numbers = #tpu.dot_dimension_numbers<[1], [0], [0], [1], [0, 0, 1, 1], [], []>} : vector<16x256xbf16>, vector<256x128xbf16>, vector<16x128xf32> -> vector<16x128xf32>
    %c0_3 = arith.constant 0 : index
    %c0_4 = arith.constant 0 : index
    %4 = vector.load %arg3[%c0_3, %c0_4] : memref<1x128xf32, #tpu.memory_space<vmem>>, vector<1x128xf32>
    %5 = vector.broadcast %4 : vector<1x128xf32> to vector<16x128xf32>
    %6 = arith.addf %3, %5 : vector<16x128xf32>
    %cst_5 = arith.constant dense<0xFF800000> : vector<16xf32>
    %7 = vector.multi_reduction <maximumf>, %6, %cst_5 [1] : vector<16x128xf32> to vector<16xf32>
    %8 = vector.shape_cast %7 : vector<16xf32> to vector<16x1xf32>
    %9 = vector.broadcast %8 : vector<16x1xf32> to vector<16x128xf32>
    %10 = arith.subf %6, %9 : vector<16x128xf32>
    %11 = math.exp %10 : vector<16x128xf32>
    %cst_6 = arith.constant dense<0.000000e+00> : vector<16xf32>
    %12 = vector.multi_reduction <add>, %11, %cst_6 [1] : vector<16x128xf32> to vector<16xf32>
    %13 = vector.shape_cast %12 : vector<16xf32> to vector<16x1xf32>
    %14 = tpu.reciprocal %13 : vector<16x1xf32> -> vector<16x1xf32>
    %15 = vector.broadcast %14 : vector<16x1xf32> to vector<16x128xf32>
    %16 = arith.mulf %11, %15 : vector<16x128xf32>
    %c0_7 = arith.constant 0 : index
    %c0_8 = arith.constant 0 : index
    %17 = vector.load %arg4[%c0_7, %c0_8] : memref<16x128xf32, #tpu.memory_space<vmem>>, vector<16x128xf32>
    tpu.vector_store %arg4[%c0_7, %c0_8], %16 {strides = array<i32>} : memref<16x128xf32, #tpu.memory_space<vmem>>, vector<16x128xf32>,
    return
  }
  func.func @transform_0(%arg0: i32) -> (i32, i32) {
    %c0_i32 = arith.constant 0 : i32
    %c0_i32_0 = arith.constant 0 : i32
    return %arg0, %c0_i32 : i32, i32
  }
  func.func @transform_1(%arg0: i32) -> (i32, i32) {
    %c0_i32 = arith.constant 0 : i32
    %c0_i32_0 = arith.constant 0 : i32
    %c0_i32_1 = arith.constant 0 : i32
    return %c0_i32, %c0_i32_0 : i32, i32
  }
  func.func @transform_2(%arg0: i32) -> (i32, i32) {
    %c0_i32 = arith.constant 0 : i32
    %c0_i32_0 = arith.constant 0 : i32
    %c0_i32_1 = arith.constant 0 : i32
    return %c0_i32, %c0_i32_0 : i32, i32
  }
  func.func @transform_3(%arg0: i32) -> (i32, i32) {
    %c0_i32 = arith.constant 0 : i32
    %c0_i32_0 = arith.constant 0 : i32
    return %arg0, %c0_i32 : i32, i32
  }
}

</mosaic_0001>

<bundles_post_ra>
// kernel: concat_mlp_forward.3
= control target key start
LH: loop header
LB: loop body
LE: loop exit
PB: predicated region body
PF: predicated region fallthrough
CT: control target
= control target key end

     0   :  { %s422_s0 = inlined_call_operand.vmem [shape: f32[16,256], index: 0, kind: input, shape index: {}]   ;;  %s423_s1 = inlined_call_operand.vmem [shape: bf16[256,128], index: 1, kind: input, shape index: {}]   ;;  %s424_s2 = inlined_call_operand.vmem [shape: f32[1,128], index: 2, kind: input, shape index: {}]   ;;  %s425_s3 = inlined_call_operand.hbm [shape: f32[16,128], index: 3, kind: output, shape index: {}]  }
   0x1   :  { %v276_v0 = vld [vmem:[%s423_s1 + $0x40] sm:$0xff]   ;;  %v278_v2 = vld [vmem:[%s423_s1 + $0x48] sm:$0xff]   ;;  %v280_v4 = vld [vmem:[%s423_s1 + $0x50] sm:$0xff]  }
   0x2   :  { %v277_v1 = vld [vmem:[%s423_s1] sm:$0xff]   ;;  %251 = vmatprep.subr.bf16.mxu0 %v276_v0  ;;  %v279_v3 = vld [vmem:[%s423_s1 + $0x8] sm:$0xff]   ;;  %v281_v5 = vld [vmem:[%s423_s1 + $0x10] sm:$0xff]  }
   0x3   :  { %252 = vmatpush3.bf16.msra.mxu0 %v277_v1  ;;  %v282_v6 = vld [vmem:[%s423_s1 + $0x58] sm:$0xff]   ;;  %v284_v8 = vld [vmem:[%s423_s1 + $0x60] sm:$0xff]   ;;  %v286_v10 = vld [vmem:[%s423_s1 + $0x68] sm:$0xff]  }
   0x4   :  { %253 = vmatprep.subr.bf16.mxu0 %v278_v2  ;;  %v283_v7 = vld [vmem:[%s423_s1 + $0x18] sm:$0xff]   ;;  %v285_v9 = vld [vmem:[%s423_s1 + $0x20] sm:$0xff]   ;;  %v17_v11 = vld [vmem:[%s422_s0 + $0x8] sm:$0xff] }
   0x5   :  { %v19_v12 = vld [vmem:[%s422_s0 + $0x18] sm:$0xff] }
   0x6   :  { %v21_v13 = vpack.c.bf16 %v19_v12, %v17_v11 }
   0x7   :  { %254 = vmatpush3.bf16.msra.mxu0 %v279_v3 }
   0x8   :  { %255 = vmatprep.subr.bf16.mxu0 %v280_v4 }
   0xb   :  { %256 = vmatpush3.bf16.msra.mxu0 %v281_v5 }
   0xc   :  { %257 = vmatprep.subr.bf16.mxu0 %v282_v6 }
   0xf   :  { %258 = vmatpush3.bf16.msra.mxu0 %v283_v7 }
  0x10   :  { %259 = vmatprep.subr.bf16.mxu0 %v284_v8 }
  0x11   :  { %8 = vsyncpa [#allocation3], 0  ;;  %v287_v14 = vld [vmem:[%s423_s1 + $0x28] sm:$0xff]   ;;  %189 = vmatprep.mubr.bf16.mxu0 %v21_v13  ;;  %v288_v15 = vld [vmem:[%s423_s1 + $0x70] sm:$0xff]  }
  0x12   :  { %v289_v16 = vld [vmem:[%s423_s1 + $0x30] sm:$0xff]   ;;  %v290_v17 = vld [vmem:[%s423_s1 + $0x78] sm:$0xff]   ;;  %v16_v19 = vld [vmem:[%s422_s0] sm:$0xff] }
  0x13   :  { %260 = vmatpush3.bf16.msra.mxu0 %v285_v9  ;;  %v291_v18 = vld [vmem:[%s423_s1 + $0x38] sm:$0xff]   ;;  %v18_v20 = vld [vmem:[%s422_s0 + $0x10] sm:$0xff]  ;;  %v234_v24 = vld [vmem:[%s424_s2] ss:$0 sm:$0xff]  ;;  %s324_s0 = smov [#allocation2]  }
  0x14   :  { %261 = vmatprep.subr.bf16.mxu0 %v286_v10  ;;  %v20_v21 = vpack.c.bf16 %v18_v20, %v16_v19  ;;  %s223_s1 = sshll.u32 %s324_s0, 4  ;;  %s224_s1 = int_to_ptr.vmem [resolvable:$true] %s223_s1 }
  0x15   :  { %s300_s2 = scalar_lea.vmem %s224_s1, 256  ;;  %p305_p1 = scmp.lt.s32.totalorder %s224_s1, %s224_s1 }
  0x16   :  { %p301_p0 = scmp.ne.s32.totalorder %s224_s1, %s300_s2  ;;  %p306_p2 = scmp.lt.s32.totalorder %s300_s2, %s300_s2 }
  0x17   :  { %262 = vmatpush3.bf16.msra.mxu0 %v287_v14 }
  0x18   :  { %263 = vmatprep.subr.bf16.mxu0 %v288_v15  ;;  %p307_p3 = por %p306_p2, %p305_p1 }
  0x1a   :  { %p308_p4 = pnand %p307_p3, %p301_p0 }
  0x1b   :  { %264 = vmatpush3.bf16.msra.mxu0 %v289_v16 }
  0x1c   :  { %265 = vmatprep.subr.bf16.mxu0 %v290_v17 }
  0x1f   :  { %266 = vmatpush3.bf16.msra.mxu0 %v291_v18 }
  0x22   :  { %190 = vmatmul.mubr.bf16.vlgmr.msra.gmra.mrb[0].mxu0 %v20_v21 }
  0xf5   :  { %v267_v22 = vpop.f32.mrb[0].mxu0 }
  0xf6   :  { %v268_v23 = vpop.f32.mrb[1].mxu0 }
  0xf7   :  { %v269_v25 = vadd.f32 %v268_v23, %v267_v22  ;;  %v270_v26 = vpop.f32.mrb[2].mxu0 }
  0xf8   :  { %v271_v27 = vpop.f32.mrb[3].mxu0 }
  0xf9   :  { %v272_v28 = vadd.f32 %v271_v27, %v270_v26  ;;  %v192_v29 = vadd.f32 %v269_v25, %v234_v24 }
  0xfb   :  { %198 = vmax.xlane.f32.xlu0 %v192_v29  ;;  %v195_v30 = vadd.f32 %v272_v28, %v234_v24 }
  0xff   :  { %200 = vmax.xlane.f32.xlu0 %v195_v30 }
 0x188   :  { %v199_v31 = vpop.xlane.xlu0 %198 }
 0x189   :  { %v202_v32 = vsub.f32 %v192_v29, %v199_v31 }
 0x18b   :  { %v204_v33 = vmul.f32 1.442695, %v202_v32 }
 0x18c   :  { %v201_v34 = vpop.xlane.xlu0 %200 }
 0x18d   :  { %292 = vpow2.f32 %v204_v33  ;;  %v203_v35 = vsub.f32 %v195_v30, %v201_v34 }
 0x18f   :  { %v206_v36 = vmul.f32 1.442695, %v203_v35 }
 0x191   :  { %294 = vpow2.f32 %v206_v36 }
 0x197   :  { %v293_v37 = vpop.eup %292 }
 0x198   :  { %208 = vadd.xlane.f32.xlu1 %v293_v37 }
 0x19b   :  { %v295_v38 = vpop.eup %294 }
 0x19c   :  { %210 = vadd.xlane.f32.xlu1 %v295_v38 }
 0x225   :  { %v209_v39 = vpop.xlane.xlu1 %208 }
 0x226   :  { %296 = vrcp.f32 %v209_v39 }
 0x229   :  { %v211_v40 = vpop.xlane.xlu1 %210 }
 0x22a   :  { %298 = vrcp.f32 %v211_v40 }
 0x230   :  { %v297_v41 = vpop.eup %296 }
 0x231   :  { %v214_v42 = vmul.f32 %v297_v41, %v293_v37 }
 0x233   :  { %216 = vst [vmem:[#allocation2] sm:$0xff] %v214_v42 }
 0x234   :  { %v299_v43 = vpop.eup %298 }
 0x235   :  { %v215_v44 = vmul.f32 %v299_v43, %v295_v38 }
 0x237   :  { %217 = vst [vmem:[#allocation2 + $0x8] sm:$0xff] %v215_v44 }
 0x238   :  { %311 = shalt.err (!%p308_p4)
}
 0x239   :  { %s312_s29 = scalar_lea.hbm %s425_s3, 256 }
 0x23a   :  { %p313_p5 = scmp.ne.s32.totalorder %s425_s3, %s312_s29  ;;  %p316_p6 = scmp.lt.u32.totalorder %s312_s29, %s425_s3 }
 0x23c   :  { %p318_p7 = pnand %p316_p6, %p313_p5 }
 0x23e   :  { %321 = shalt.err (!%p318_p7)
}
 0x23f   :  { %s325_s7 = smov 128   ;;  %s326_s8 = smov 8  }
 0x240   :  { %229 = dma.vmem_to_hbm [thread:$0]  %s224_s1, 256, %s425_s3, [#allocation3], %s325_s7, %s325_s7, %s326_s8  }
 0x241   :  { %322 = dma.done.wait [#allocation3], 256  }
 0x242   :  { %323 = vsyncadd [#allocation3], 4294967040 }
 0x243   :  { %233 = vsyncpa [#allocation3], 1 }

// kernel: concat_mlp_forward.2
= control target key start
LH: loop header
LB: loop body
LE: loop exit
PB: predicated region body
PF: predicated region fallthrough
CT: control target
= control target key end

     0   :  { %v274_v1 = vmov 0   ;;  %vm46_vm0 = vcmask 130048   ;;  %v156_v7 = vlaneseq  ;;  %v275_v32 = vmov 0.0   ;;  %s347_s3 = inlined_call_operand.vmem [shape: bf16[16,256], index: 3, kind: input, shape index: {}]   ;;  %s348_s2 = inlined_call_operand.vmem [shape: bf16[16,256], index: 2, kind: input, shape index: {}]   ;;  %s349_s1 = inlined_call_operand.vmem [shape: bf16[16,16], index: 1, kind: input, shape index: {}]   ;;  %s350_s0 = inlined_call_operand.vmem [shape: bf16[16,16], index: 0, kind: input, shape index: {}]   ;;  %s351_s4 = inlined_call_operand.vmem [shape: f32[1,256], index: 4, kind: input, shape index: {}]   ;;  %s352_s5 = inlined_call_operand.vmem [shape: f32[16,256], index: 5, kind: output, shape index: {0}]   ;;  %s353_s6 = inlined_call_operand.vmem [shape: f32[1,2,256], index: 6, kind: output, shape index: {1}]  }
   0x1   :  { %v266_v0 = vld [vmem:[%s347_s3 + $0x4] ss:$8 sps:$4 sm:$0xff]   ;;  %82 = vmatprep.mubr.bf16.mxu1 %v274_v1  ;;  %143 = vmatprep.mubr.bf16.mxu0 %v274_v1  ;;  %v270_v3 = vld [vmem:[%s347_s3] ss:$8 sps:$4 sm:$0xff]   ;;  %vm227_vm2 = vcmask 1040384  }
   0x2   :  { %v268_v2 = vld [vmem:[%s348_s2 + $0x4] ss:$8 sps:$4 sm:$0xff]   ;;  %50 = vmatprep.subr.bf16.mxu1 %v266_v0  ;;  %v271_v4 = vld [vmem:[%s348_s2] ss:$8 sps:$4 sm:$0xff]   ;;  %v157_v8 = vshrl.u32 %v156_v7, 7 }
   0x3   :  { %111 = vmatprep.subr.bf16.mxu0 %v268_v2  ;;  %v272_v5 = vld [vmem:[%s349_s1] sm:$0xff]   ;;  %51 = vmatpush1.bf16.msra.mxu1 %v270_v3 }
   0x4   :  { %112 = vmatpush1.bf16.msra.mxu0 %v271_v4  ;;  %v273_v6 = vld [vmem:[%s350_s0] sm:$0xff]   ;;  %v158_v9 = vsub.s32 0, %v157_v8  ;;  %v162_v11 = vsub.s32 1, %v157_v8  ;;  %v181_v13 = vadd.s32 8, %v157_v8 }
   0x5   :  { %v154_v10 = vld [vmem:[%s351_s4] sm:$0x3] }
   0x6   :  { %253 = vmatmul.mubr.msk.bf16.vlgmr.msra.gmra.mrb[0].mxu1 %vm46_vm0, %v272_v5  ;;  %v159_v12 = vrot.slane %v154_v10, %v158_v9  ;;  %v163_v16 = vrot.slane %v154_v10, %v162_v11  ;;  %vm186_vm1 = vcmp.lt.s32.totalorder %v181_v13, 10 }
   0x7   :  { %257 = vmatmul.mubr.msk.bf16.vlgmr.msra.gmra.mrb[0].mxu0 %vm46_vm0, %v273_v6  ;;  %v258_v33 = vsel %vm186_vm1, 1.0, %v275_v32 }
  0xd9   :  { %v84_v14 = vpop.f32.mrb[0].mxu1 }
  0xda   :  { %v145_v15 = vpop.f32.mrb[0].mxu0  ;;  %v86_v18 = vpop.f32.mrb[1].mxu1 }
  0xdb   :  { %v146_v17 = vadd.f32 %v145_v15, %v84_v14  ;;  %v147_v19 = vpop.f32.mrb[1].mxu0  ;;  %v88_v21 = vpop.f32.mrb[2].mxu1 }
  0xdc   :  { %v148_v20 = vadd.f32 %v147_v19, %v86_v18  ;;  %v149_v22 = vpop.f32.mrb[2].mxu0  ;;  %v90_v25 = vpop.f32.mrb[3].mxu1 }
  0xdd   :  { %v166_v23 = vadd.f32 %v159_v12, %v146_v17  ;;  %v150_v24 = vadd.f32 %v149_v22, %v88_v21  ;;  %v151_v26 = vpop.f32.mrb[3].mxu0 }
  0xde   :  { %v167_v27 = vadd.f32 %v163_v16, %v148_v20  ;;  %v152_v28 = vadd.f32 %v151_v26, %v90_v25 }
  0xdf   :  { %v170_v29 = vmax.f32 %v166_v23, 0.0  ;;  %v168_v30 = vadd.f32 %v159_v12, %v150_v24 }
  0xe0   :  { %v171_v31 = vmax.f32 %v167_v27, 0.0  ;;  %v169_v34 = vadd.f32 %v163_v16, %v152_v28 }
  0xe1   :  { %174 = vst [vmem:[%s352_s5] sm:$0xff] %v170_v29  ;;  %v172_v35 = vmax.f32 %v168_v30, 0.0  ;;  %v209_v39 = vmul.f32 %v170_v29, %v170_v29 }
  0xe2   :  { %175 = vst [vmem:[%s352_s5 + $0x8] sm:$0xff] %v171_v31  ;;  %v173_v36 = vmax.f32 %v169_v34, 0.0  ;;  %v210_v42 = vmul.f32 %v171_v31, %v171_v31 }
  0xe3   :  { %176 = vst [vmem:[%s352_s5 + $0x10] sm:$0xff] %v172_v35  ;;  %v193_v37 = vmul.f32 %v258_v33, %v172_v35 }
  0xe4   :  { %177 = vst [vmem:[%s352_s5 + $0x18] sm:$0xff] %v173_v36  ;;  %v194_v38 = vmul.f32 %v258_v33, %v173_v36 }
  0xe5   :  { %v195_v40 = vadd.f32 %v193_v37, %v170_v29  ;;  %v211_v41 = vmul.f32 %v193_v37, %v172_v35 }
  0xe6   :  { %v202_v43 = vadd.f32 %v194_v38, %v171_v31  ;;  %v212_v44 = vmul.f32 %v194_v38, %v173_v36 }
  0xe7   :  { %v196_v45 = vrot.slane %v195_v40, 4  ;;  %v213_v46 = vadd.f32 %v211_v41, %v209_v39 }
  0xe8   :  { %v203_v47 = vrot.slane %v202_v43, 4  ;;  %v220_v48 = vadd.f32 %v212_v44, %v210_v42 }
  0xe9   :  { %v197_v49 = vadd.f32 %v196_v45, %v195_v40  ;;  %v214_v50 = vrot.slane %v213_v46, 4 }
  0xea   :  { %v204_v51 = vadd.f32 %v203_v47, %v202_v43  ;;  %v221_v52 = vrot.slane %v220_v48, 4 }
  0xeb   :  { %v198_v53 = vrot.slane %v197_v49, 2  ;;  %v215_v54 = vadd.f32 %v214_v50, %v213_v46 }
  0xec   :  { %v205_v55 = vrot.slane %v204_v51, 2  ;;  %v222_v56 = vadd.f32 %v221_v52, %v220_v48 }
  0xed   :  { %v199_v57 = vadd.f32 %v198_v53, %v197_v49  ;;  %v216_v58 = vrot.slane %v215_v54, 2 }
  0xee   :  { %v206_v59 = vadd.f32 %v205_v55, %v204_v51  ;;  %v223_v60 = vrot.slane %v222_v56, 2 }
  0xef   :  { %v200_v61 = vrot.slane %v199_v57, 1  ;;  %v217_v62 = vadd.f32 %v216_v58, %v215_v54 }
  0xf0   :  { %v207_v63 = vrot.slane %v206_v59, 1  ;;  %v224_v0 = vadd.f32 %v223_v60, %v222_v56 }
  0xf1   :  { %v218_v1 = vrot.slane %v217_v62, 1  ;;  %v201_v3 = vadd.f32 %v200_v61, %v199_v57 }
  0xf2   :  { %v225_v2 = vrot.slane %v224_v0, 1  ;;  %v208_v5 = vadd.f32 %v207_v63, %v206_v59 }
  0xf3   :  { %v219_v4 = vadd.f32 %v218_v1, %v217_v62 }
  0xf4   :  { %v226_v6 = vadd.f32 %v225_v2, %v224_v0 }
  0xf5   :  { %v228_v7 = vsel %vm227_vm2, %v201_v3, %v219_v4 }
  0xf6   :  { %v229_v8 = vsel %vm227_vm2, %v208_v5, %v226_v6 }
  0xf7   :  { %v232_v9 = vcombine.low %v228_v7, %v229_v8 }
  0xf9   :  { %259 = vst.sshfl [vmem:[%s353_s6] sm:$0x33 pattern:$0x76325410] %v232_v9 }

</bundles_post_ra>
